<compile_context>
chip_gen: v5e
topology: v5e:2x2
jax: 0.10.0
libtpu: 0.0.40
codegen_flags: <defaults>
</compile_context>

<pallas_src>
import functools
from typing import NamedTuple

import jax
import jax.numpy as jnp
from jax.experimental import pallas as pl
from jax.experimental.pallas import tpu as pltpu


# ----------------------------------------------------------------------------
# helpers
# ----------------------------------------------------------------------------
def _round_up(x: int, m: int) -> int:
    return (x + m - 1) // m * m


def _largest_aligned_divisor(total: int, cap: int, align: int = 128) -> int:
    """Largest multiple of `align` that divides `total` and is <= cap.

    `total` must itself be a multiple of `align`; always returns >= align.
    """
    best = align
    d = align
    limit = min(total, max(cap, align))
    while d <= limit:
        if total % d == 0:
            best = d
        d += align
    return best


def _vmem_capacity_bytes() -> int:
    """Physical VMEM per TensorCore; conservative fallback if unqueryable."""
    try:
        return int(pltpu.get_tpu_info().vmem_capacity_bytes)
    except Exception:
        return 64 * 1024 * 1024  # v7x-sized (smallest current generation)


# ----------------------------------------------------------------------------
# one-time parameter preparation (do NOT run this per forward call)
# ----------------------------------------------------------------------------
class SkipGramParams(NamedTuple):
    w1t: jax.Array          # [Ip, Hp]  compute dtype (pre-transposed, padded)
    b1: jax.Array           # [1,  Hp]  float32
    w2t: jax.Array          # [Hp, Op]  compute dtype (pre-transposed, padded)
    b2: jax.Array           # [1,  Op]  float32
    input_size: int
    hidden_size: int
    output_size: int


def prepare_skipgram_params(w1, b1, w2, b2, *, compute_dtype=jnp.bfloat16):
    """One-time layout plumbing (hoisted out of the per-call path).

    w1: [H, I], b1: [H], w2: [O, H], b2: [O]   (torch nn.Linear layout)
    Pads every axis to a multiple of 128, pre-transposes the weights so the
    kernels contract along the leading axis (no in-VMEM .T), and casts to
    `compute_dtype` (bf16 by default; use jnp.float32 for strict f32 parity).
    """
    H, I = w1.shape
    O, H2 = w2.shape
    assert H2 == H and b1.shape == (H,) and b2.shape == (O,)

    Ip, Hp, Op = _round_up(I, 128), _round_up(H, 128), _round_up(O, 128)
    cd = compute_dtype
    w1t = jnp.zeros((Ip, Hp), cd).at[:I, :H].set(w1.T.astype(cd))
    b1p = jnp.zeros((1, Hp), jnp.float32).at[0, :H].set(b1.astype(jnp.float32))
    w2t = jnp.zeros((Hp, Op), cd).at[:H, :O].set(w2.T.astype(cd))
    b2p = jnp.zeros((1, Op), jnp.float32).at[0, :O].set(b2.astype(jnp.float32))
    return SkipGramParams(w1t, b1p, w2t, b2p, I, H, O)


# ----------------------------------------------------------------------------
# kernels
# ----------------------------------------------------------------------------
def _resident_kernel(x_ref, w1t_ref, b1_ref, w2t_ref, b2_ref, out_ref):
    """Both layers for one batch tile; weights are whole-array VMEM residents."""
    h = jnp.dot(x_ref[...], w1t_ref[...], preferred_element_type=jnp.float32)
    h = h + b1_ref[...]                                       # f32 bias add
    y = jnp.dot(h.astype(w2t_ref.dtype), w2t_ref[...],
                preferred_element_type=jnp.float32)
    out_ref[...] = (y + b2_ref[...]).astype(out_ref.dtype)


def _streamed_kernel(x_ref, w1t_ref, b1_ref, w2t_ref, b2_ref, out_ref,
                     h_acc, h_lo, *, nk):
    """Phase-axis kernel: t < nk accumulates the hidden tile (layer 1);
    t >= nk streams lane-dense W2/out tiles against the resident hidden."""
    t = pl.program_id(1)

    @pl.when(t == 0)
    def _init():
        # Fold b1 AND the first K-block matmul into the accumulator init
        # (removes one full (tB,Hp) read-modify-write; also the nk==1 case).
        h_acc[...] = (jnp.dot(x_ref[...], w1t_ref[...],
                              preferred_element_type=jnp.float32)
                      + b1_ref[...])

    if nk > 1:  # static: the accumulate branch vanishes when I fits one K tile
        @pl.when(jnp.logical_and(t >= 1, t < nk))
        def _layer1():
            h_acc[...] += jnp.dot(x_ref[...], w1t_ref[...],
                                  preferred_element_type=jnp.float32)

    @pl.when(t == nk)
    def _pack():
        # Cast the hidden to the compute dtype ONCE per batch tile (not per
        # layer-2 step).
        h_lo[...] = h_acc[...].astype(h_lo.dtype)

    @pl.when(t >= nk)
    def _layer2():
        y = jnp.dot(h_lo[...], w2t_ref[...], preferred_element_type=jnp.float32)
        out_ref[...] = (y + b2_ref[...]).astype(out_ref.dtype)


# ----------------------------------------------------------------------------
# forward wrapper
# ----------------------------------------------------------------------------
def embedding_skipgram_forward(x, params: SkipGramParams, *,
                               block_b=256, block_k=1024, block_o=1024,
                               out_dtype=jnp.float32,
                               w2_buffer_depth=3,
                               force_streaming=False):
    """Fused EmbeddingSkipGramModel forward.  x: [B, input_size] -> [B, output_size]."""
    B, I = x.shape
    assert I == params.input_size
    w1t, b1p, w2t, b2p = params.w1t, params.b1, params.w2t, params.b2
    O = params.output_size
    Ip, Hp = w1t.shape
    _, Op = w2t.shape
    cd = w1t.dtype
    ics = jnp.dtype(cd).itemsize
    ocs = jnp.dtype(out_dtype).itemsize

    # ---- batch tiling (x / out are the only per-call-padded operands) -----
    tB = min(block_b, _round_up(B, 8))
    # Make the "parallel" batch axis have >= 2 blocks when possible so both
    # v7x TensorCores get work (no-op / harmless on single-TC v5e/v6e).
    if _round_up(B, tB) // tB < 2 and tB >= 16:
        tB = _round_up(tB // 2, 8)
    Bp = _round_up(B, tB)
    nB = Bp // tB

    xp = jnp.zeros((Bp, Ip), cd).at[:B, :I].set(x.astype(cd))

    # ---- generation-aware VMEM budget --------------------------------------
    capacity = _vmem_capacity_bytes()
    budget = int(0.70 * capacity)   # ~45 MiB on v7x (64 MiB), ~90 MiB on v5e/v6e

    resident_bytes = (w1t.size + w2t.size) * ics + (b1p.size + b2p.size) * 4
    resident_streams = 2 * tB * Ip * ics + 2 * tB * Op * ocs   # dbl-buffered x/out
    need_resident = resident_bytes + resident_streams + (2 << 20)

    flops = 2 * B * I * params.hidden_size + 2 * B * params.hidden_size * O

    if (not force_streaming) and need_resident <= budget:
        # ---------------------- path A: resident weights --------------------
        # Weights + biases are DMA'd into VMEM once and held for the whole
        # grid; only x / out batch tiles stream (removes the ~nB x weight
        # re-streaming of the previous schedule).
        vmem_limit = int(min(0.85 * capacity,
                             max(need_resident + (8 << 20), 32 << 20)))
        out_p = pl.pallas_call(
            _resident_kernel,
            out_shape=jax.ShapeDtypeStruct((Bp, Op), out_dtype),
            grid=(nB,),
            in_specs=[
                pl.BlockSpec((tB, Ip), lambda i: (i, 0)),            # x batch tile
                pl.BlockSpec(memory_space=pltpu.MemorySpace.VMEM),   # W1t resident
                pl.BlockSpec(memory_space=pltpu.MemorySpace.VMEM),   # b1 resident
                pl.BlockSpec(memory_space=pltpu.MemorySpace.VMEM),   # W2t resident
                pl.BlockSpec(memory_space=pltpu.MemorySpace.VMEM),   # b2 resident
            ],
            out_specs=pl.BlockSpec((tB, Op), lambda i: (i, 0)),
            compiler_params=pltpu.CompilerParams(
                dimension_semantics=("parallel",),
                vmem_limit_bytes=vmem_limit,
            ),
            cost_estimate=pl.CostEstimate(
                flops=int(flops), transcendentals=0,
                bytes_accessed=int(xp.size * ics + resident_bytes
                                   + Bp * Op * ocs),
            ),
        )(xp, w1t, b1p, w2t, b2p)
        return out_p[:B, :O]

    # ------------------------ path B: streamed weights ----------------------
    # Fallback when W1/W2 do not fit the VMEM budget (vocab-sized layers).
    # Phase axis t: t < nk reduces over K tiles (layer 1), t >= nk streams
    # lane-dense W2/out tiles against the hidden tile resident in VMEM scratch.
    tK = _largest_aligned_divisor(Ip, block_k)
    tO = _largest_aligned_divisor(Op, block_o)
    nk, nj = Ip // tK, Op // tO

    # Pinned index maps: no x/W1 re-DMA during the layer-2 phase and no
    # W2/b2/out re-DMA during the layer-1 phase.
    x_map = lambda i, t: (i, jnp.minimum(t, nk - 1))
    w1t_map = lambda i, t: (jnp.minimum(t, nk - 1), 0)
    b1_map = lambda i, t: (0, 0)
    w2t_map = lambda i, t: (0, jnp.maximum(t - nk, 0))
    b2_map = lambda i, t: (0, jnp.maximum(t - nk, 0))
    out_map = lambda i, t: (i, jnp.maximum(t - nk, 0))

    w2_spec = pl.BlockSpec((Hp, tO), w2t_map)
    if w2_buffer_depth > 2 and nj >= w2_buffer_depth:
        # Deeper pipelining on the compute-light layer-2 weight stream.
        try:
            w2_spec = pl.BlockSpec((Hp, tO), w2t_map,
                                   pipeline_mode=pl.Buffered(w2_buffer_depth))
        except (AttributeError, TypeError):
            pass  # plain double-buffering on older jax

    need_stream = ((2 * tB * tK + 2 * tK * Hp
                    + max(2, w2_buffer_depth) * Hp * tO + tB * Hp) * ics
                   + 2 * tB * tO * ocs + tB * Hp * 4 + (2 << 20))
    vmem_limit = int(min(0.85 * capacity,
                         max(need_stream + (8 << 20), 48 << 20)))

    out_p = pl.pallas_call(
        functools.partial(_streamed_kernel, nk=nk),
        out_shape=jax.ShapeDtypeStruct((Bp, Op), out_dtype),
        grid=(nB, nk + nj),
        in_specs=[
            pl.BlockSpec((tB, tK), x_map),
            pl.BlockSpec((tK, Hp), w1t_map),
            pl.BlockSpec((1, Hp), b1_map),
            w2_spec,
            pl.BlockSpec((1, tO), b2_map),
        ],
        out_specs=pl.BlockSpec((tB, tO), out_map),
        scratch_shapes=[pltpu.VMEM((tB, Hp), jnp.float32),   # f32 hidden accumulator
                        pltpu.VMEM((tB, Hp), cd)],           # hidden packed once/tile
        compiler_params=pltpu.CompilerParams(
            dimension_semantics=("parallel", "arbitrary"),
            vmem_limit_bytes=vmem_limit,
        ),
        cost_estimate=pl.CostEstimate(
            flops=int(flops), transcendentals=0,
            # Honest traffic estimate: weights are re-streamed once per batch
            # tile (x nB) under this schedule.
            bytes_accessed=int(xp.size * ics
                               + nB * (w1t.size + w2t.size) * ics
                               + nB * (b1p.size + b2p.size) * 4
                               + Bp * Op * ocs),
        ),
    )(xp, w1t, b1p, w2t, b2p)
    return out_p[:B, :O]


# ----------------------------------------------------------------------------
# reference + self-test
# ----------------------------------------------------------------------------
def _reference_bf16(x, w1, b1, w2, b2, cd=jnp.bfloat16):
    h = jnp.dot(x.astype(cd), w1.T.astype(cd),
                preferred_element_type=jnp.float32) + b1
    return jnp.dot(h.astype(cd), w2.T.astype(cd),
                   preferred_element_type=jnp.float32) + b2


def _make_linear(kw, kb, out_f, in_f):
    lim = 1.0 / (in_f ** 0.5)
    w = jax.random.uniform(kw, (out_f, in_f), jnp.float32, -lim, lim)
    b = jax.random.uniform(kb, (out_f,), jnp.float32, -lim, lim)
    return w, b


if __name__ == "__main__":
    key = jax.random.PRNGKey(0)
    (kx, kw1, kb1, kw2, kb2,
     kx2, kw12, kb12, kw22, kb22) = jax.random.split(key, 10)

    # ---- test 1: small shapes, resident-weights path (path A) -------------
    batch, input_size, hidden_size, output_size = 8, 16, 32, 16
    x = jax.random.normal(kx, (batch, input_size), jnp.float32)
    w1, b1 = _make_linear(kw1, kb1, hidden_size, input_size)
    w2, b2 = _make_linear(kw2, kb2, output_size, hidden_size)

    params = prepare_skipgram_params(w1, b1, w2, b2)      # done ONCE, not per call
    out = jax.block_until_ready(embedding_skipgram_forward(x, params))
    assert out.shape == (batch, output_size)
    assert jnp.allclose(out, _reference_bf16(x, w1, b1, w2, b2),
                        atol=2e-3, rtol=2e-3), "path A mismatch vs bf16 reference"
    assert jnp.allclose(out, (x @ w1.T + b1) @ w2.T + b2,
                        atol=5e-2, rtol=5e-2), "path A mismatch vs f32 reference"

    # ---- test 2: force the streamed fallback path (path B) ----------------
    B2, I2, H2, O2 = 32, 256, 64, 256
    x2 = jax.random.normal(kx2, (B2, I2), jnp.float32)
    w1b, b1b = _make_linear(kw12, kb12, H2, I2)
    w2b, b2b = _make_linear(kw22, kb22, O2, H2)

    params2 = prepare_skipgram_params(w1b, b1b, w2b, b2b)
    out2 = jax.block_until_ready(
        embedding_skipgram_forward(x2, params2, force_streaming=True,
                                   block_b=16, block_k=128, block_o=128))
    assert out2.shape == (B2, O2)
    assert jnp.allclose(out2, _reference_bf16(x2, w1b, b1b, w2b, b2b),
                        atol=3e-3, rtol=3e-3), "path B mismatch vs bf16 reference"
    assert jnp.allclose(out2, (x2 @ w1b.T + b1b) @ w2b.T + b2b,
                        atol=5e-2, rtol=5e-2), "path B mismatch vs f32 reference"

    print("KERNEL_OK")
</pallas_src>

<mosaic_0001>
module attributes {stable_mosaic.version = 11 : i64} {
  func.func @_resident_kernel(%arg0: i32, %arg1: memref<8x128xbf16, #tpu.memory_space<vmem>>, %arg2: memref<128x128xbf16, #tpu.memory_space<vmem>>, %arg3: memref<1x128xf32, #tpu.memory_space<vmem>>, %arg4: memref<128x128xbf16, #tpu.memory_space<vmem>>, %arg5: memref<1x128xf32, #tpu.memory_space<vmem>>, %arg6: memref<8x128xf32, #tpu.memory_space<vmem>>) attributes {dimension_semantics = [#tpu.dimension_semantics<parallel>], iteration_bounds = array<i64: 1>, scalar_prefetch = 0 : i64, scratch_operands = 0 : i64, tpu.core_type = #tpu.core_type<tc>, window_params = [{transform_indices = @transform_0, window_bounds = array<i64: 8, 128>}, {pipeline_mode = #tpu.pipeline_mode<synchronous>, transform_indices = @transform_1, window_bounds = array<i64: 128, 128>}, {pipeline_mode = #tpu.pipeline_mode<synchronous>, transform_indices = @transform_2, window_bounds = array<i64: 1, 128>}, {pipeline_mode = #tpu.pipeline_mode<synchronous>, transform_indices = @transform_3, window_bounds = array<i64: 128, 128>}, {pipeline_mode = #tpu.pipeline_mode<synchronous>, transform_indices = @transform_4, window_bounds = array<i64: 1, 128>}, {transform_indices = @transform_5, window_bounds = array<i64: 8, 128>}]} {
    %c0 = arith.constant 0 : index
    %c0_0 = arith.constant 0 : index
    %0 = vector.load %arg1[%c0, %c0_0] : memref<8x128xbf16, #tpu.memory_space<vmem>>, vector<8x128xbf16>
    %c0_1 = arith.constant 0 : index
    %c0_2 = arith.constant 0 : index
    %1 = vector.load %arg2[%c0_1, %c0_2] : memref<128x128xbf16, #tpu.memory_space<vmem>>, vector<128x128xbf16>
    %cst = arith.constant dense<0.000000e+00> : vector<8x128xf32>
    %2 = tpu.matmul %0, %1, %cst {dimension_numbers = #tpu.dot_dimension_numbers<[1], [0], [0], [1], [0, 0, 1, 1], [], []>} : vector<8x128xbf16>, vector<128x128xbf16>, vector<8x128xf32> -> vector<8x128xf32>
    %c0_3 = arith.constant 0 : index
    %c0_4 = arith.constant 0 : index
    %3 = vector.load %arg3[%c0_3, %c0_4] : memref<1x128xf32, #tpu.memory_space<vmem>>, vector<1x128xf32>
    %4 = vector.broadcast %3 : vector<1x128xf32> to vector<8x128xf32>
    %5 = arith.addf %2, %4 : vector<8x128xf32>
    %6 = arith.truncf %5 : vector<8x128xf32> to vector<8x128xbf16>
    %c0_5 = arith.constant 0 : index
    %c0_6 = arith.constant 0 : index
    %7 = vector.load %arg4[%c0_5, %c0_6] : memref<128x128xbf16, #tpu.memory_space<vmem>>, vector<128x128xbf16>
    %cst_7 = arith.constant dense<0.000000e+00> : vector<8x128xf32>
    %8 = tpu.matmul %6, %7, %cst_7 {dimension_numbers = #tpu.dot_dimension_numbers<[1], [0], [0], [1], [0, 0, 1, 1], [], []>} : vector<8x128xbf16>, vector<128x128xbf16>, vector<8x128xf32> -> vector<8x128xf32>
    %c0_8 = arith.constant 0 : index
    %c0_9 = arith.constant 0 : index
    %9 = vector.load %arg5[%c0_8, %c0_9] : memref<1x128xf32, #tpu.memory_space<vmem>>, vector<1x128xf32>
    %10 = vector.broadcast %9 : vector<1x128xf32> to vector<8x128xf32>
    %11 = arith.addf %8, %10 : vector<8x128xf32>
    %c0_10 = arith.constant 0 : index
    %c0_11 = arith.constant 0 : index
    %12 = vector.load %arg6[%c0_10, %c0_11] : memref<8x128xf32, #tpu.memory_space<vmem>>, vector<8x128xf32>
    tpu.vector_store %arg6[%c0_10, %c0_11], %11 {strides = array<i32>} : memref<8x128xf32, #tpu.memory_space<vmem>>, vector<8x128xf32>,
    return
  }
  func.func @transform_0(%arg0: i32) -> (i32, i32) {
    %c0_i32 = arith.constant 0 : i32
    %c0_i32_0 = arith.constant 0 : i32
    return %arg0, %c0_i32 : i32, i32
  }
  func.func @transform_1(%arg0: i32) -> (i32, i32) {
    %c0_i32 = arith.constant 0 : i32
    %c0_i32_0 = arith.constant 0 : i32
    %c0_i32_1 = arith.constant 0 : i32
    return %c0_i32, %c0_i32_0 : i32, i32
  }
  func.func @transform_2(%arg0: i32) -> (i32, i32) {
    %c0_i32 = arith.constant 0 : i32
    %c0_i32_0 = arith.constant 0 : i32
    %c0_i32_1 = arith.constant 0 : i32
    return %c0_i32, %c0_i32_0 : i32, i32
  }
  func.func @transform_3(%arg0: i32) -> (i32, i32) {
    %c0_i32 = arith.constant 0 : i32
    %c0_i32_0 = arith.constant 0 : i32
    %c0_i32_1 = arith.constant 0 : i32
    return %c0_i32, %c0_i32_0 : i32, i32
  }
  func.func @transform_4(%arg0: i32) -> (i32, i32) {
    %c0_i32 = arith.constant 0 : i32
    %c0_i32_0 = arith.constant 0 : i32
    %c0_i32_1 = arith.constant 0 : i32
    return %c0_i32, %c0_i32_0 : i32, i32
  }
  func.func @transform_5(%arg0: i32) -> (i32, i32) {
    %c0_i32 = arith.constant 0 : i32
    %c0_i32_0 = arith.constant 0 : i32
    return %arg0, %c0_i32 : i32, i32
  }
}

</mosaic_0001>

<bundles_post_ra>
// kernel: tpu_custom_call.1
= control target key start
LH: loop header
LB: loop body
LE: loop exit
PB: predicated region body
PF: predicated region fallthrough
CT: control target
= control target key end

     0   :  { %10 = vsyncpa [#allocation3], 0  ;;  %s493_s0 = inlined_call_operand.hbm [shape: bf16[8,128], index: 0, kind: input, shape index: {}]   ;;  %s494_s1 = inlined_call_operand.hbm [shape: bf16[128,128], index: 1, kind: input, shape index: {}]   ;;  %s495_s2 = inlined_call_operand.vmem [shape: f32[1,128], index: 2, kind: input, shape index: {}]   ;;  %s496_s3 = inlined_call_operand.hbm [shape: bf16[128,128], index: 3, kind: input, shape index: {}]   ;;  %s497_s4 = inlined_call_operand.vmem [shape: f32[1,128], index: 4, kind: input, shape index: {}]   ;;  %s498_s5 = inlined_call_operand.hbm [shape: f32[8,128], index: 5, kind: output, shape index: {}]  }
   0x1   :  { %11 = vsyncpa [#allocation6], 0  ;;  %s28_s20 = sshll.u32 %s494_s1, 4  ;;  %s29_s20 = int_to_ptr.hbm [resolvable:$true] %s28_s20 }
   0x2   :  { %12 = vsyncpa [#allocation4], 0  ;;  %s439_s21 = smov [#allocation5]   ;;  %s18_s25 = sshll.u32 %s493_s0, 4  ;;  %s19_s25 = int_to_ptr.hbm [resolvable:$true] %s18_s25 }
   0x3   :  { %s30_s22 = sshll.u32 %s439_s21, 4  ;;  %s440_s26 = smov 64   ;;  %s31_s22 = int_to_ptr.vmem [resolvable:$true] %s30_s22 }
   0x4   :  { %s441_s27 = smov 4   ;;  %s442_s28 = smov [#allocation2]  }
   0x5   :  { %36 = dma.hbm_to_vmem [thread:$0]  %s29_s20, 1024, %s31_s22, [#allocation6], %s440_s26, %s440_s26, %s441_s27  }
   0x6   :  { %s20_s29 = sshll.u32 %s442_s28, 4  ;;  %s43_s7 = sshll.u32 %s496_s3, 4  ;;  %s21_s29 = int_to_ptr.vmem [resolvable:$true] %s20_s29  ;;  %s44_s7 = int_to_ptr.hbm [resolvable:$true] %s43_s7 }
   0x7   :  { %23 = dma.hbm_to_vmem [thread:$0]  %s19_s25, 64, %s21_s29, [#allocation3]  }
   0x8   :  { %s443_s1 = smov [#allocation7]  }
   0x9   :  { %s45_s8 = sshll.u32 %s443_s1, 4  ;;  %s46_s8 = int_to_ptr.vmem [resolvable:$true] %s45_s8 }
   0xa   :  { %51 = dma.hbm_to_vmem [thread:$0]  %s44_s7, 1024, %s46_s8, [#allocation6], %s440_s26, %s440_s26, %s441_s27  }
   0xb   :  { %433 = dma.done.wait [#allocation3], 64  }
   0xc   :  { %434 = vsyncadd [#allocation3], 4294967232 }
   0xd   :  { %435 = dma.done.wait [#allocation6], 2048  }
   0xe   :  { %436 = vsyncadd [#allocation6], 4294965248  ;;  %v320_v0 = vld [vmem:[#allocation5 + $0x38] sm:$0xff]  ;;  %v319_v1 = vld [vmem:[#allocation5 + $0x30] sm:$0xff]  ;;  %s444_s11 = smov [#allocation8]   ;;  %s238_s15 = sshll.u32 %s498_s5, 4  ;;  %s239_s15 = int_to_ptr.hbm [resolvable:$true] %s238_s15 }
   0xf   :  { %135 = vmatpush.bf16.msra.mxu0 %v320_v0  ;;  %v328_v2 = vld [vmem:[#allocation7 + $0x38] sm:$0xff]  ;;  %v327_v3 = vld [vmem:[#allocation7 + $0x30] sm:$0xff]  ;;  %v318_v4 = vld [vmem:[#allocation5 + $0x28] sm:$0xff]  ;;  %s236_s12 = sshll.u32 %s444_s11, 4  ;;  %s237_s12 = int_to_ptr.vmem [resolvable:$true] %s236_s12 }
  0x10   :  { %217 = vmatpush.bf16.msra.mxu1 %v328_v2  ;;  %v326_v5 = vld [vmem:[#allocation7 + $0x28] sm:$0xff]  ;;  %v317_v6 = vld [vmem:[#allocation5 + $0x20] sm:$0xff]  ;;  %v316_v8 = vld [vmem:[#allocation5 + $0x18] sm:$0xff] }
  0x11   :  { %v325_v7 = vld [vmem:[#allocation7 + $0x20] sm:$0xff]  ;;  %v324_v9 = vld [vmem:[#allocation7 + $0x18] sm:$0xff]  ;;  %v315_v10 = vld [vmem:[#allocation5 + $0x10] sm:$0xff] }
  0x12   :  { %v323_v11 = vld [vmem:[#allocation7 + $0x10] sm:$0xff]  ;;  %v314_v12 = vld [vmem:[#allocation5 + $0x8] sm:$0xff]  ;;  %v313_v14 = vld [vmem:[#allocation5] sm:$0xff] }
  0x13   :  { %136 = vmatpush.bf16.msra.mxu0 %v319_v1  ;;  %v322_v13 = vld [vmem:[#allocation7 + $0x8] sm:$0xff]  ;;  %v66_v15 = vld [vmem:[#allocation2] sm:$0xf]  ;;  %v321_v16 = vld [vmem:[#allocation7] sm:$0xff] }
  0x14   :  { %218 = vmatpush.bf16.msra.mxu1 %v327_v3  ;;  %v335_v17 = vld [vmem:[%s495_s2] ss:$0 sm:$0xff] }
  0x15   :  { %v336_v22 = vld [vmem:[%s497_s4] ss:$0 sm:$0xff] }
  0x17   :  { %137 = vmatpush.bf16.msra.mxu0 %v318_v4 }
  0x18   :  { %219 = vmatpush.bf16.msra.mxu1 %v326_v5 }
  0x1b   :  { %138 = vmatpush.bf16.msra.mxu0 %v317_v6 }
  0x1c   :  { %220 = vmatpush.bf16.msra.mxu1 %v325_v7 }
  0x1f   :  { %139 = vmatpush.bf16.msra.mxu0 %v316_v8 }
  0x20   :  { %221 = vmatpush.bf16.msra.mxu1 %v324_v9 }
  0x23   :  { %140 = vmatpush.bf16.msra.mxu0 %v315_v10 }
  0x24   :  { %222 = vmatpush.bf16.msra.mxu1 %v323_v11 }
  0x27   :  { %141 = vmatpush.bf16.msra.mxu0 %v314_v12 }
  0x28   :  { %223 = vmatpush.bf16.msra.mxu1 %v322_v13 }
  0x2b   :  { %142 = vmatpush.bf16.msra.mxu0 %v313_v14 }
  0x2c   :  { %224 = vmatpush.bf16.msra.mxu1 %v321_v16 }
  0x2e   :  { %143 = vmatmul.bf16.vlgmr.msra.gmra.mxu0 %v66_v15 }
  0xab   :  { %v144_v18 = vpop.f32.mrf.mxu0 }
  0xac   :  { %v145_v19 = vadd.f32 %v335_v17, %v144_v18 }
  0xae   :  { %v148_v20 = vpack.c.bf16 %v145_v19, %v145_v19 }
  0xb0   :  { %225 = vmatmul.bf16.vlgmr.msra.gmra.mxu1 %v148_v20 }
  0xb3   :  { %v146_v21 = vpop.f32.mrf.mxu0 }
 0x12d   :  { %v226_v23 = vpop.f32.mrf.mxu1 }
 0x12e   :  { %v227_v24 = vadd.f32 %v336_v22, %v226_v23 }
 0x130   :  { %230 = vst [vmem:[#allocation8] sm:$0xff] %v227_v24 }
 0x131   :  { %241 = dma.vmem_to_hbm [thread:$0]  %s237_s12, 128, %s239_s15, [#allocation4]  }
 0x135   :  { %v228_v25 = vpop.f32.mrf.mxu1 }
 0x136   :  { %437 = dma.done.wait [#allocation4], 128  }
 0x137   :  { %438 = vsyncadd [#allocation4], 4294967168 }
 0x138   :  { %246 = vsyncpa [#allocation3], 1 }
 0x139   :  { %247 = vsyncpa [#allocation6], 1 }
 0x13a   :  { %248 = vsyncpa [#allocation4], 1 }

</bundles_post_ra>
